<compile_context>
chip_gen: v7x
topology: tpu7x:2x2x1
jax: 0.10.0
libtpu: 0.0.40
codegen_flags: <defaults>
</compile_context>

<pallas_src>
import functools
from math import sqrt

import jax
import jax.numpy as jnp
from jax.experimental import pallas as pl
from jax.experimental.pallas import tpu as pltpu


# ---------------------------------------------------------------------------
# tiling helpers
# ---------------------------------------------------------------------------
def _pick_head_group(H, E):
    """Smallest divisor Hb of H with Hb*E a multiple of 128; else all heads."""
    for hb in range(1, H):
        if H % hb == 0 and (hb * E) % 128 == 0:
            return hb
    return H


def _pick_q_tile(L, max_tile=256):
    """Query-axis tile: full L if small, else a divisor that is a multiple of 8."""
    if L <= max_tile:
        return L
    for t in (max_tile, 128, 64, 32, 16, 8):
        if L % t == 0:
            return t
    return L


# ---------------------------------------------------------------------------
# Fused kernel: per-(batch, q-tile, head-group)
#   scores_h = (q_h / sqrt(E)) @ k_h^T ; attn_h = softmax(scores_h)
#   out_h    = attn_h @ v_h
#   acc     += concat_h(out_h) @ W[head_group rows]          (projection, fused)
#   on last head-group:  y = acc + bias
# ---------------------------------------------------------------------------
def _fused_attn_proj_kernel(q_ref, k_ref, v_ref, w_ref, b_ref,
                            y_ref, attn_ref, acc_ref, *, Hb, E):
    hg = pl.program_id(2)

    @pl.when(hg == 0)
    def _():
        acc_ref[...] = jnp.zeros_like(acc_ref)

    scale = 1.0 / sqrt(E)
    # Pre-scale Q (cheaper than scaling the (TL, S) scores).
    q = q_ref[0] * jnp.asarray(scale, dtype=q_ref.dtype)   # (TL, Hb*E)
    k = k_ref[0]                                           # (S,  Hb*E)
    v = v_ref[0]                                           # (S,  Hb*E)

    outs = []
    for j in range(Hb):                                    # static unroll over heads
        lo = j * E
        qh = q[:, lo:lo + E]                               # (TL, E)
        kh = k[:, lo:lo + E]                               # (S,  E)
        vh = v[:, lo:lo + E]                               # (S,  E)

        # (TL, E) x (S, E) contracted on E -> (TL, S); no explicit k.T.
        scores = jax.lax.dot_general(
            qh, kh,
            dimension_numbers=(((1,), (1,)), ((), ())),
            preferred_element_type=jnp.float32)

        # numerically-stable softmax over S
        m = jnp.max(scores, axis=-1, keepdims=True)
        p = jnp.exp(scores - m)
        denom = jnp.sum(p, axis=-1, keepdims=True)
        attn = p * pl.reciprocal(denom, approx=True)       # (TL, S) f32

        attn_ref[0, j] = attn.astype(attn_ref.dtype)
        outs.append(jnp.dot(attn.astype(vh.dtype), vh,
                            preferred_element_type=jnp.float32))   # (TL, E)

    out_group = outs[0] if Hb == 1 else jnp.concatenate(outs, axis=-1)  # (TL, Hb*E)

    # Partial output projection for this head-group's rows of W.
    w = w_ref[...]                                         # (Hb*E, Dout)
    acc_ref[...] += jnp.dot(out_group.astype(w.dtype), w,
                            preferred_element_type=jnp.float32)

    @pl.when(hg == pl.num_programs(2) - 1)
    def _():
        y_ref[0] = (acc_ref[...] + b_ref[...]).astype(y_ref.dtype)


# ---------------------------------------------------------------------------
# FirstAttentionLayer forward (mix=False, attn_mask=None, full attention)
# ---------------------------------------------------------------------------
def first_attention_layer_forward(queries, keys, values, params, n_heads):
    B, L, d_model = queries.shape
    _, S, _ = keys.shape
    H = n_heads
    assert d_model % H == 0
    E = d_model // H                     # d_keys == d_values == d_model // n_heads

    w = params["w_out"]                  # (H*E, d_model_out)  == PyTorch weight.T
    b2 = params["b_out"].reshape(1, -1)  # (1, d_model_out)
    d_out = w.shape[1]

    Hb = _pick_head_group(H, E)          # heads per grid step (lane-dense blocks)
    n_hg = H // Hb
    TL = _pick_q_tile(L)                 # query tile
    n_lt = L // TL

    kernel = functools.partial(_fused_attn_proj_kernel, Hb=Hb, E=E)

    # TODO(synk): for very long S, also tile the key axis (online softmax) and
    # raise vmem_limit_bytes per-generation; not needed at these sizes.
    y, attn = pl.pallas_call(
        kernel,
        out_shape=(
            jax.ShapeDtypeStruct((B, L, d_out), queries.dtype),
            jax.ShapeDtypeStruct((B, H, L, S), queries.dtype),
        ),
        grid_spec=pltpu.PrefetchScalarGridSpec(
            num_scalar_prefetch=0,
            grid=(B, n_lt, n_hg),
            in_specs=[
                # heads selected straight out of the native (B, L, D) layout
                pl.BlockSpec((1, TL, Hb * E), lambda bb, lt, hg: (bb, lt, hg)),
                pl.BlockSpec((1, S, Hb * E), lambda bb, lt, hg: (bb, 0, hg)),
                pl.BlockSpec((1, S, Hb * E), lambda bb, lt, hg: (bb, 0, hg)),
                pl.BlockSpec((Hb * E, d_out), lambda bb, lt, hg: (hg, 0)),
                pl.BlockSpec((1, d_out), lambda bb, lt, hg: (0, 0)),
            ],
            out_specs=[
                # projected output: revisited across the head-group axis (accumulator)
                pl.BlockSpec((1, TL, d_out), lambda bb, lt, hg: (bb, lt, 0)),
                pl.BlockSpec((1, Hb, TL, S), lambda bb, lt, hg: (bb, hg, lt, 0)),
            ],
            scratch_shapes=[pltpu.VMEM((TL, d_out), jnp.float32)],
        ),
        compiler_params=pltpu.CompilerParams(
            dimension_semantics=("parallel", "parallel", "arbitrary"),
        ),
    )(queries, keys, values, w, b2)
    return y, attn


# ---------------------------------------------------------------------------
# Deterministic parameter init (shapes from nn.Linear(d_values*n_heads, d_model))
# ---------------------------------------------------------------------------
def init_params(key, d_model, n_heads):
    d_values = d_model // n_heads
    d_in = d_values * n_heads
    kw, kb = jax.random.split(key)
    bound = 1.0 / sqrt(d_in)
    # stored as (d_in, d_out) == PyTorch weight.T
    w_out = jax.random.uniform(kw, (d_in, d_model), jnp.float32, -bound, bound)
    b_out = jax.random.uniform(kb, (d_model,), jnp.float32, -bound, bound)
    return {"w_out": w_out, "b_out": b_out}


if __name__ == "__main__":
    B, L, S, d_model, n_heads = 2, 8, 8, 32, 4

    key = jax.random.PRNGKey(0)
    kq, kk, kv, kp = jax.random.split(key, 4)
    queries = jax.random.normal(kq, (B, L, d_model), jnp.float32)
    keys = jax.random.normal(kk, (B, S, d_model), jnp.float32)
    values = jax.random.normal(kv, (B, S, d_model), jnp.float32)
    params = init_params(kp, d_model, n_heads)

    fwd = jax.jit(functools.partial(first_attention_layer_forward, n_heads=n_heads))
    y, attn = fwd(queries, keys, values, params)
    jax.block_until_ready((y, attn))

    # sanity check vs pure-JAX reference
    E = d_model // n_heads
    qr = queries.reshape(B, L, n_heads, E)
    kr = keys.reshape(B, S, n_heads, E)
    vr = values.reshape(B, S, n_heads, E)
    scores = jnp.einsum("blhe,bshe->bhls", qr, kr) / jnp.sqrt(jnp.float32(E))
    attn_ref = jax.nn.softmax(scores, axis=-1)
    out_ref = jnp.einsum("bhls,bshe->blhe", attn_ref, vr).reshape(B, L, -1)
    y_ref = out_ref @ params["w_out"] + params["b_out"]

    # approx reciprocal in softmax -> slightly looser tolerance than exact divide
    assert jnp.allclose(y, y_ref, atol=2e-3, rtol=2e-3), "projection output mismatch"
    assert jnp.allclose(attn, attn_ref, atol=2e-3, rtol=2e-3), "attention matrix mismatch"

    print("KERNEL_OK")
</pallas_src>

<mosaic_0001>
module attributes {stable_mosaic.version = 11 : i64} {
  func.func @_fused_attn_proj_kernel(%arg0: i32, %arg1: i32, %arg2: i32, %arg3: memref<1x8x32xf32, #tpu.memory_space<vmem>>, %arg4: memref<1x8x32xf32, #tpu.memory_space<vmem>>, %arg5: memref<1x8x32xf32, #tpu.memory_space<vmem>>, %arg6: memref<32x32xf32, #tpu.memory_space<vmem>>, %arg7: memref<1x32xf32, #tpu.memory_space<vmem>>, %arg8: memref<1x8x32xf32, #tpu.memory_space<vmem>>, %arg9: memref<1x4x8x8xf32, #tpu.memory_space<vmem>>, %arg10: memref<8x32xf32, #tpu.memory_space<vmem>>) attributes {dimension_semantics = [#tpu.dimension_semantics<parallel>, #tpu.dimension_semantics<parallel>, #tpu.dimension_semantics<arbitrary>], iteration_bounds = array<i64: 2, 1, 1>, scalar_prefetch = 0 : i64, scratch_operands = 1 : i64, tpu.core_type = #tpu.core_type<tc>, window_params = [{transform_indices = @transform_0, window_bounds = array<i64: 1, 8, 32>}, {transform_indices = @transform_1, window_bounds = array<i64: 1, 8, 32>}, {transform_indices = @transform_2, window_bounds = array<i64: 1, 8, 32>}, {transform_indices = @transform_3, window_bounds = array<i64: 32, 32>}, {pipeline_mode = #tpu.pipeline_mode<synchronous>, transform_indices = @transform_4, window_bounds = array<i64: 1, 32>}, {transform_indices = @transform_5, window_bounds = array<i64: 1, 8, 32>}, {transform_indices = @transform_6, window_bounds = array<i64: 1, 4, 8, 8>}]} {
    %c0_i32 = arith.constant 0 : i32
    %0 = arith.cmpi eq, %arg2, %c0_i32 : i32
    %1 = arith.extui %0 : i1 to i32
    %c0_i32_0 = arith.constant 0 : i32
    %2 = arith.cmpi ne, %1, %c0_i32_0 : i32
    scf.if %2 {
      %cst_47 = arith.constant 0.000000e+00 : f32
      %92 = vector.broadcast %cst_47 : f32 to vector<8x32xf32>
      %c0_48 = arith.constant 0 : index
      %c0_49 = arith.constant 0 : index
      %93 = vector.load %arg10[%c0_48, %c0_49] : memref<8x32xf32, #tpu.memory_space<vmem>>, vector<8x32xf32>
      tpu.vector_store %arg10[%c0_48, %c0_49], %92 {strides = array<i32>} : memref<8x32xf32, #tpu.memory_space<vmem>>, vector<8x32xf32>,
    } else {
    }
    %c0 = arith.constant 0 : index
    %c0_1 = arith.constant 0 : index
    %c0_2 = arith.constant 0 : index
    %3 = vector.load %arg3[%c0, %c0_1, %c0_2] : memref<1x8x32xf32, #tpu.memory_space<vmem>>, vector<1x8x32xf32>
    %4 = vector.shape_cast %3 : vector<1x8x32xf32> to vector<8x32xf32>
    %cst = arith.constant 0.353553385 : f32
    %5 = vector.broadcast %cst : f32 to vector<8x32xf32>
    %6 = arith.mulf %4, %5 : vector<8x32xf32>
    %c0_3 = arith.constant 0 : index
    %c0_4 = arith.constant 0 : index
    %c0_5 = arith.constant 0 : index
    %7 = vector.load %arg4[%c0_3, %c0_4, %c0_5] : memref<1x8x32xf32, #tpu.memory_space<vmem>>, vector<1x8x32xf32>
    %8 = vector.shape_cast %7 : vector<1x8x32xf32> to vector<8x32xf32>
    %c0_6 = arith.constant 0 : index
    %c0_7 = arith.constant 0 : index
    %c0_8 = arith.constant 0 : index
    %9 = vector.load %arg5[%c0_6, %c0_7, %c0_8] : memref<1x8x32xf32, #tpu.memory_space<vmem>>, vector<1x8x32xf32>
    %10 = vector.shape_cast %9 : vector<1x8x32xf32> to vector<8x32xf32>
    %11 = vector.extract_strided_slice %6 {offsets = [0, 0], sizes = [8, 8], strides = [1, 1]} : vector<8x32xf32> to vector<8x8xf32>
    %12 = vector.extract_strided_slice %8 {offsets = [0, 0], sizes = [8, 8], strides = [1, 1]} : vector<8x32xf32> to vector<8x8xf32>
    %13 = vector.extract_strided_slice %10 {offsets = [0, 0], sizes = [8, 8], strides = [1, 1]} : vector<8x32xf32> to vector<8x8xf32>
    %cst_9 = arith.constant dense<0.000000e+00> : vector<8x8xf32>
    %14 = tpu.matmul %11, %12, %cst_9 {dimension_numbers = #tpu.dot_dimension_numbers<[1], [1], [0], [0], [0, 0, 1, 0], [], []>} : vector<8x8xf32>, vector<8x8xf32>, vector<8x8xf32> -> vector<8x8xf32>
    %cst_10 = arith.constant dense<0xFF800000> : vector<8xf32>
    %15 = vector.multi_reduction <maximumf>, %14, %cst_10 [1] : vector<8x8xf32> to vector<8xf32>
    %16 = vector.shape_cast %15 : vector<8xf32> to vector<8x1xf32>
    %17 = vector.broadcast %16 : vector<8x1xf32> to vector<8x8xf32>
    %18 = arith.subf %14, %17 : vector<8x8xf32>
    %19 = math.exp %18 : vector<8x8xf32>
    %cst_11 = arith.constant dense<0.000000e+00> : vector<8xf32>
    %20 = vector.multi_reduction <add>, %19, %cst_11 [1] : vector<8x8xf32> to vector<8xf32>
    %21 = vector.shape_cast %20 : vector<8xf32> to vector<8x1xf32>
    %22 = tpu.reciprocal %21 {approx = true} : vector<8x1xf32> -> vector<8x1xf32>
    %23 = vector.broadcast %22 : vector<8x1xf32> to vector<8x8xf32>
    %24 = arith.mulf %19, %23 : vector<8x8xf32>
    %c0_12 = arith.constant 0 : index
    %c0_13 = arith.constant 0 : index
    %c0_14 = arith.constant 0 : index
    %c0_15 = arith.constant 0 : index
    %25 = vector.load %arg9[%c0_12, %c0_13, %c0_14, %c0_15] : memref<1x4x8x8xf32, #tpu.memory_space<vmem>>, vector<1x1x8x8xf32>
    %26 = vector.shape_cast %25 : vector<1x1x8x8xf32> to vector<8x8xf32>
    %27 = vector.shape_cast %24 : vector<8x8xf32> to vector<1x1x8x8xf32>
    tpu.vector_store %arg9[%c0_12, %c0_13, %c0_14, %c0_15], %27 {strides = array<i32>} : memref<1x4x8x8xf32, #tpu.memory_space<vmem>>, vector<1x1x8x8xf32>,
    %cst_16 = arith.constant dense<0.000000e+00> : vector<8x8xf32>
    %28 = tpu.matmul %24, %13, %cst_16 {dimension_numbers = #tpu.dot_dimension_numbers<[1], [0], [0], [1], [0, 0, 1, 1], [], []>} : vector<8x8xf32>, vector<8x8xf32>, vector<8x8xf32> -> vector<8x8xf32>
    %29 = vector.extract_strided_slice %6 {offsets = [0, 8], sizes = [8, 8], strides = [1, 1]} : vector<8x32xf32> to vector<8x8xf32>
    %30 = vector.extract_strided_slice %8 {offsets = [0, 8], sizes = [8, 8], strides = [1, 1]} : vector<8x32xf32> to vector<8x8xf32>
    %31 = vector.extract_strided_slice %10 {offsets = [0, 8], sizes = [8, 8], strides = [1, 1]} : vector<8x32xf32> to vector<8x8xf32>
    %cst_17 = arith.constant dense<0.000000e+00> : vector<8x8xf32>
    %32 = tpu.matmul %29, %30, %cst_17 {dimension_numbers = #tpu.dot_dimension_numbers<[1], [1], [0], [0], [0, 0, 1, 0], [], []>} : vector<8x8xf32>, vector<8x8xf32>, vector<8x8xf32> -> vector<8x8xf32>
    %cst_18 = arith.constant dense<0xFF800000> : vector<8xf32>
    %33 = vector.multi_reduction <maximumf>, %32, %cst_18 [1] : vector<8x8xf32> to vector<8xf32>
    %34 = vector.shape_cast %33 : vector<8xf32> to vector<8x1xf32>
    %35 = vector.broadcast %34 : vector<8x1xf32> to vector<8x8xf32>
    %36 = arith.subf %32, %35 : vector<8x8xf32>
    %37 = math.exp %36 : vector<8x8xf32>
    %cst_19 = arith.constant dense<0.000000e+00> : vector<8xf32>
    %38 = vector.multi_reduction <add>, %37, %cst_19 [1] : vector<8x8xf32> to vector<8xf32>
    %39 = vector.shape_cast %38 : vector<8xf32> to vector<8x1xf32>
    %40 = tpu.reciprocal %39 {approx = true} : vector<8x1xf32> -> vector<8x1xf32>
    %41 = vector.broadcast %40 : vector<8x1xf32> to vector<8x8xf32>
    %42 = arith.mulf %37, %41 : vector<8x8xf32>
    %c0_20 = arith.constant 0 : index
    %c1 = arith.constant 1 : index
    %c0_21 = arith.constant 0 : index
    %c0_22 = arith.constant 0 : index
    %43 = vector.load %arg9[%c0_20, %c1, %c0_21, %c0_22] : memref<1x4x8x8xf32, #tpu.memory_space<vmem>>, vector<1x1x8x8xf32>
    %44 = vector.shape_cast %43 : vector<1x1x8x8xf32> to vector<8x8xf32>
    %45 = vector.shape_cast %42 : vector<8x8xf32> to vector<1x1x8x8xf32>
    tpu.vector_store %arg9[%c0_20, %c1, %c0_21, %c0_22], %45 {strides = array<i32>} : memref<1x4x8x8xf32, #tpu.memory_space<vmem>>, vector<1x1x8x8xf32>,
    %cst_23 = arith.constant dense<0.000000e+00> : vector<8x8xf32>
    %46 = tpu.matmul %42, %31, %cst_23 {dimension_numbers = #tpu.dot_dimension_numbers<[1], [0], [0], [1], [0, 0, 1, 1], [], []>} : vector<8x8xf32>, vector<8x8xf32>, vector<8x8xf32> -> vector<8x8xf32>
    %47 = vector.extract_strided_slice %6 {offsets = [0, 16], sizes = [8, 8], strides = [1, 1]} : vector<8x32xf32> to vector<8x8xf32>
    %48 = vector.extract_strided_slice %8 {offsets = [0, 16], sizes = [8, 8], strides = [1, 1]} : vector<8x32xf32> to vector<8x8xf32>
    %49 = vector.extract_strided_slice %10 {offsets = [0, 16], sizes = [8, 8], strides = [1, 1]} : vector<8x32xf32> to vector<8x8xf32>
    %cst_24 = arith.constant dense<0.000000e+00> : vector<8x8xf32>
    %50 = tpu.matmul %47, %48, %cst_24 {dimension_numbers = #tpu.dot_dimension_numbers<[1], [1], [0], [0], [0, 0, 1, 0], [], []>} : vector<8x8xf32>, vector<8x8xf32>, vector<8x8xf32> -> vector<8x8xf32>
    %cst_25 = arith.constant dense<0xFF800000> : vector<8xf32>
    %51 = vector.multi_reduction <maximumf>, %50, %cst_25 [1] : vector<8x8xf32> to vector<8xf32>
    %52 = vector.shape_cast %51 : vector<8xf32> to vector<8x1xf32>
    %53 = vector.broadcast %52 : vector<8x1xf32> to vector<8x8xf32>
    %54 = arith.subf %50, %53 : vector<8x8xf32>
    %55 = math.exp %54 : vector<8x8xf32>
    %cst_26 = arith.constant dense<0.000000e+00> : vector<8xf32>
    %56 = vector.multi_reduction <add>, %55, %cst_26 [1] : vector<8x8xf32> to vector<8xf32>
    %57 = vector.shape_cast %56 : vector<8xf32> to vector<8x1xf32>
    %58 = tpu.reciprocal %57 {approx = true} : vector<8x1xf32> -> vector<8x1xf32>
    %59 = vector.broadcast %58 : vector<8x1xf32> to vector<8x8xf32>
    %60 = arith.mulf %55, %59 : vector<8x8xf32>
    %c0_27 = arith.constant 0 : index
    %c2 = arith.constant 2 : index
    %c0_28 = arith.constant 0 : index
    %c0_29 = arith.constant 0 : index
    %61 = vector.load %arg9[%c0_27, %c2, %c0_28, %c0_29] : memref<1x4x8x8xf32, #tpu.memory_space<vmem>>, vector<1x1x8x8xf32>
    %62 = vector.shape_cast %61 : vector<1x1x8x8xf32> to vector<8x8xf32>
    %63 = vector.shape_cast %60 : vector<8x8xf32> to vector<1x1x8x8xf32>
    tpu.vector_store %arg9[%c0_27, %c2, %c0_28, %c0_29], %63 {strides = array<i32>} : memref<1x4x8x8xf32, #tpu.memory_space<vmem>>, vector<1x1x8x8xf32>,
    %cst_30 = arith.constant dense<0.000000e+00> : vector<8x8xf32>
    %64 = tpu.matmul %60, %49, %cst_30 {dimension_numbers = #tpu.dot_dimension_numbers<[1], [0], [0], [1], [0, 0, 1, 1], [], []>} : vector<8x8xf32>, vector<8x8xf32>, vector<8x8xf32> -> vector<8x8xf32>
    %65 = vector.extract_strided_slice %6 {offsets = [0, 24], sizes = [8, 8], strides = [1, 1]} : vector<8x32xf32> to vector<8x8xf32>
    %66 = vector.extract_strided_slice %8 {offsets = [0, 24], sizes = [8, 8], strides = [1, 1]} : vector<8x32xf32> to vector<8x8xf32>
    %67 = vector.extract_strided_slice %10 {offsets = [0, 24], sizes = [8, 8], strides = [1, 1]} : vector<8x32xf32> to vector<8x8xf32>
    %cst_31 = arith.constant dense<0.000000e+00> : vector<8x8xf32>
    %68 = tpu.matmul %65, %66, %cst_31 {dimension_numbers = #tpu.dot_dimension_numbers<[1], [1], [0], [0], [0, 0, 1, 0], [], []>} : vector<8x8xf32>, vector<8x8xf32>, vector<8x8xf32> -> vector<8x8xf32>
    %cst_32 = arith.constant dense<0xFF800000> : vector<8xf32>
    %69 = vector.multi_reduction <maximumf>, %68, %cst_32 [1] : vector<8x8xf32> to vector<8xf32>
    %70 = vector.shape_cast %69 : vector<8xf32> to vector<8x1xf32>
    %71 = vector.broadcast %70 : vector<8x1xf32> to vector<8x8xf32>
    %72 = arith.subf %68, %71 : vector<8x8xf32>
    %73 = math.exp %72 : vector<8x8xf32>
    %cst_33 = arith.constant dense<0.000000e+00> : vector<8xf32>
    %74 = vector.multi_reduction <add>, %73, %cst_33 [1] : vector<8x8xf32> to vector<8xf32>
    %75 = vector.shape_cast %74 : vector<8xf32> to vector<8x1xf32>
    %76 = tpu.reciprocal %75 {approx = true} : vector<8x1xf32> -> vector<8x1xf32>
    %77 = vector.broadcast %76 : vector<8x1xf32> to vector<8x8xf32>
    %78 = arith.mulf %73, %77 : vector<8x8xf32>
    %c0_34 = arith.constant 0 : index
    %c3 = arith.constant 3 : index
    %c0_35 = arith.constant 0 : index
    %c0_36 = arith.constant 0 : index
    %79 = vector.load %arg9[%c0_34, %c3, %c0_35, %c0_36] : memref<1x4x8x8xf32, #tpu.memory_space<vmem>>, vector<1x1x8x8xf32>
    %80 = vector.shape_cast %79 : vector<1x1x8x8xf32> to vector<8x8xf32>
    %81 = vector.shape_cast %78 : vector<8x8xf32> to vector<1x1x8x8xf32>
    tpu.vector_store %arg9[%c0_34, %c3, %c0_35, %c0_36], %81 {strides = array<i32>} : memref<1x4x8x8xf32, #tpu.memory_space<vmem>>, vector<1x1x8x8xf32>,
    %cst_37 = arith.constant dense<0.000000e+00> : vector<8x8xf32>
    %82 = tpu.matmul %78, %67, %cst_37 {dimension_numbers = #tpu.dot_dimension_numbers<[1], [0], [0], [1], [0, 0, 1, 1], [], []>} : vector<8x8xf32>, vector<8x8xf32>, vector<8x8xf32> -> vector<8x8xf32>
    %83 = tpu.concatenate %28, %46, %64, %82 in 1 : vector<8x8xf32>, vector<8x8xf32>, vector<8x8xf32>, vector<8x8xf32> -> vector<8x32xf32>
    %c0_38 = arith.constant 0 : index
    %c0_39 = arith.constant 0 : index
    %84 = vector.load %arg6[%c0_38, %c0_39] : memref<32x32xf32, #tpu.memory_space<vmem>>, vector<32x32xf32>
    %c0_40 = arith.constant 0 : index
    %c0_41 = arith.constant 0 : index
    %85 = vector.load %arg10[%c0_40, %c0_41] : memref<8x32xf32, #tpu.memory_space<vmem>>, vector<8x32xf32>
    %cst_42 = arith.constant dense<0.000000e+00> : vector<8x32xf32>
    %86 = tpu.matmul %83, %84, %cst_42 {dimension_numbers = #tpu.dot_dimension_numbers<[1], [0], [0], [1], [0, 0, 1, 1], [], []>} : vector<8x32xf32>, vector<32x32xf32>, vector<8x32xf32> -> vector<8x32xf32>
    %87 = arith.addf %85, %86 : vector<8x32xf32>
    %c0_43 = arith.constant 0 : index
    %c0_44 = arith.constant 0 : index
    %88 = vector.load %arg10[%c0_43, %c0_44] : memref<8x32xf32, #tpu.memory_space<vmem>>, vector<8x32xf32>
    tpu.vector_store %arg10[%c0_43, %c0_44], %87 {strides = array<i32>} : memref<8x32xf32, #tpu.memory_space<vmem>>, vector<8x32xf32>,
    %c0_i32_45 = arith.constant 0 : i32
    %89 = arith.cmpi eq, %arg2, %c0_i32_45 : i32
    %90 = arith.extui %89 : i1 to i32
    %c0_i32_46 = arith.constant 0 : i32
    %91 = arith.cmpi ne, %90, %c0_i32_46 : i32
    scf.if %91 {
      %c0_47 = arith.constant 0 : index
      %c0_48 = arith.constant 0 : index
      %92 = vector.load %arg10[%c0_47, %c0_48] : memref<8x32xf32, #tpu.memory_space<vmem>>, vector<8x32xf32>
      %c0_49 = arith.constant 0 : index
      %c0_50 = arith.constant 0 : index
      %93 = vector.load %arg7[%c0_49, %c0_50] : memref<1x32xf32, #tpu.memory_space<vmem>>, vector<1x32xf32>
      %94 = vector.broadcast %93 : vector<1x32xf32> to vector<8x32xf32>
      %95 = arith.addf %92, %94 : vector<8x32xf32>
      %c0_51 = arith.constant 0 : index
      %c0_52 = arith.constant 0 : index
      %c0_53 = arith.constant 0 : index
      %96 = vector.load %arg8[%c0_51, %c0_52, %c0_53] : memref<1x8x32xf32, #tpu.memory_space<vmem>>, vector<1x8x32xf32>
      %97 = vector.shape_cast %96 : vector<1x8x32xf32> to vector<8x32xf32>
      %98 = vector.shape_cast %95 : vector<8x32xf32> to vector<1x8x32xf32>
      tpu.vector_store %arg8[%c0_51, %c0_52, %c0_53], %98 {strides = array<i32>} : memref<1x8x32xf32, #tpu.memory_space<vmem>>, vector<1x8x32xf32>,
    } else {
    }
    return
  }
  func.func @transform_0(%arg0: i32, %arg1: i32, %arg2: i32) -> (i32, i32, i32) {
    %c0_i32 = arith.constant 0 : i32
    return %arg0, %arg1, %arg2 : i32, i32, i32
  }
  func.func @transform_1(%arg0: i32, %arg1: i32, %arg2: i32) -> (i32, i32, i32) {
    %c0_i32 = arith.constant 0 : i32
    %c0_i32_0 = arith.constant 0 : i32
    return %arg0, %c0_i32, %arg2 : i32, i32, i32
  }
  func.func @transform_2(%arg0: i32, %arg1: i32, %arg2: i32) -> (i32, i32, i32) {
    %c0_i32 = arith.constant 0 : i32
    %c0_i32_0 = arith.constant 0 : i32
    return %arg0, %c0_i32, %arg2 : i32, i32, i32
  }
  func.func @transform_3(%arg0: i32, %arg1: i32, %arg2: i32) -> (i32, i32) {
    %c0_i32 = arith.constant 0 : i32
    %c0_i32_0 = arith.constant 0 : i32
    return %arg2, %c0_i32 : i32, i32
  }
  func.func @transform_4(%arg0: i32, %arg1: i32, %arg2: i32) -> (i32, i32) {
    %c0_i32 = arith.constant 0 : i32
    %c0_i32_0 = arith.constant 0 : i32
    %c0_i32_1 = arith.constant 0 : i32
    return %c0_i32, %c0_i32_0 : i32, i32
  }
  func.func @transform_5(%arg0: i32, %arg1: i32, %arg2: i32) -> (i32, i32, i32) {
    %c0_i32 = arith.constant 0 : i32
    %c0_i32_0 = arith.constant 0 : i32
    return %arg0, %arg1, %c0_i32 : i32, i32, i32
  }
  func.func @transform_6(%arg0: i32, %arg1: i32, %arg2: i32) -> (i32, i32, i32, i32) {
    %c0_i32 = arith.constant 0 : i32
    %c0_i32_0 = arith.constant 0 : i32
    return %arg0, %arg2, %arg1, %c0_i32 : i32, i32, i32, i32
  }
}

</mosaic_0001>

<bundles_post_ra>
// kernel: first_attention_layer_forward.1
= control target key start
LH: loop header
LB: loop body
LE: loop exit
PB: predicated region body
PF: predicated region fallthrough
CT: control target
= control target key end

     0   :  { %s2353_s0 = inlined_call_operand.hbm [shape: f32[2,8,32], index: 0, kind: input, shape index: {}]   ;;  %s2354_s1 = inlined_call_operand.hbm [shape: f32[2,8,32], index: 1, kind: input, shape index: {}]   ;;  %s2355_s2 = inlined_call_operand.hbm [shape: f32[2,8,32], index: 2, kind: input, shape index: {}]   ;;  %s2356_s3 = inlined_call_operand.hbm [shape: f32[32,32], index: 3, kind: input, shape index: {}]   ;;  %s2357_s4 = inlined_call_operand.vmem [shape: f32[1,32], index: 4, kind: input, shape index: {}]   ;;  %s2358_s5 = inlined_call_operand.hbm [shape: f32[2,8,32], index: 5, kind: output, shape index: {0}]   ;;  %s2359_s6 = inlined_call_operand.hbm [shape: f32[2,4,8,8], index: 6, kind: output, shape index: {1}]  }
   0x1   :  { %2378 = sst [smem:[#allocation25_spill]] %s2354_s1 }
   0x2   :  { %2379 = sst [smem:[#allocation26_spill]] %s2357_s4 }
   0x3   :  { %2380 = sst [smem:[#allocation27_spill]] %s2358_s5 }
   0x4   :  { %2381 = sst [smem:[#allocation28_spill]] %s2359_s6 }
   0x5   :  { %12 = vsyncpa [#allocation4], 0 }
   0x6   :  { %14 = vsyncpa [#allocation4 + $0x1], 0 }
   0x7   :  { %15 = vsyncpa [#allocation7], 0 }
   0x8   :  { %17 = vsyncpa [#allocation7 + $0x1], 0 }
   0x9   :  { %18 = vsyncpa [#allocation10], 0 }
   0xa   :  { %19 = vsyncpa [#allocation5], 0 }
   0xb   :  { %21 = vsyncpa [#allocation5 + $0x1], 0 }
   0xc   :  { %22 = vsyncpa [#allocation13], 0 }
   0xd   :  { %24 = vsyncpa [#allocation13 + $0x1], 0  ;;  %s1944_s21 = smov 0   ;;  %s1946_s22 = smov 0  }
   0xe   :  { %s1948_s23 = smov 0   ;;  %s1950_s24 = smov 0  }
   0xf   :  { %s1952_s25 = smov 0   ;;  %s1954_s26 = smov 0  }
  0x10 LB: > { %2382 = sst [smem:[#allocation19_spill]] %s1869_s21  ;;  %s49_s27 = sadd.s32 1, %s1885_s25  ;;  %s1889_s26 = sphi %s1954_s26, %s30_s26   ;;  %s1885_s25 = sphi %s1952_s25, %s2416_s25   ;;  %s1881_s24 = sphi %s1950_s24, %s2415_s24   ;;  %s1877_s23 = sphi %s1948_s23, %s2419_s23   ;;  %s1873_s22 = sphi %s1946_s22, %s2418_s22   ;;  %s1869_s21 = sphi %s1944_s21, %s2417_s21  }
  0x11   : > { %2383 = sst [smem:[#allocation20_spill]] %s1885_s25  ;;  %s60_s28 = sadd.s32 1, %s1877_s23 }
  0x12   : > { %2384 = sst [smem:[#allocation21_spill]] %s1889_s26  ;;  %p51_p0 = scmp.ge.s32.totalorder %s49_s27, 2 }
  0x13   : > { %p2360_p1 = scmp.ne.s32.totalorder %s1877_s23, %s1873_s22  ;;  %p68_p2 = scmp.eq.s32.totalorder %s1889_s26, 0 }
  0x14   : > { %s2421_s27 = smov (%p51_p0, %s49_s27), 0  ;;  %p1569_p5 = scmp.lt.s32.totalorder %s1889_s26, 2 }
  0x15   : > { %2385 = sst [smem:[#allocation22_spill]] %s2421_s27  ;;  %p69_p4 = por %p68_p2, %p2360_p1 }
  0x16   : > { %s53_s29 = ssub.s32 %s1885_s25, %s2421_s27  ;;  %s2361_s30 = sand.u32 1, %s1877_s23  }
  0x17   : > { %p58_p6 = scmp.eq.s32.totalorder %s53_s29, 0  ;;  %s1991_s7 = sshll.u32 %s2361_s30, 3 }
  0x18   : > { %s1994_s8 = sshll.u32 %s1885_s25, 7  ;;  %p1996_p7 = pnand %p1569_p5, %p69_p4 }
  0x19   : > { %s2001_s10 = scalar_select %p58_p6, %s1877_s23, %s60_s28  }
  0x1a   : > { %s2386_s9 = scalar_select %p1996_p7, 1, 0 }
  0x1b   : > { %2387 = sst [smem:[#allocation23_spill]] %s2001_s10  ;;  %s297_s11 = sand.u32 1, %s1889_s26  }
  0x1c   : > { %s2388_s1 = sld [smem:[#allocation25_spill]]  ;;  %s301_s15 = scalar_lea.vmem [#allocation6], %s1991_s7 }
  0x1d   : > { %s309_s16 = sshll.u32 %s301_s15, 4  ;;  %s2013_s17 = scalar_lea.sflag [#allocation7], %s297_s11  ;;  %s2011_s16 = int_to_ptr.vmem [resolvable:$true] %s309_s16 }
  0x1e   : > { %p2019_p9 = pneg %p1996_p7 }
  0x20   : > { %s2389_s19 = scalar_select %p2019_p9, 1, 0 }
  0x22   : > { %s2008_s14 = scalar_lea.hbm %s2388_s1, %s1994_s8  ;;  %s1654_s29 = scalar_lea.hbm %s2388_s1, 256 }
  0x23   : > { %s1649_s18 = scalar_lea.hbm %s2008_s14, 128  ;;  %p1655_p12 = scmp.lt.u32.totalorder %s2008_s14, %s2388_s1 }
  0x24   : > { %p1650_p8 = scmp.ne.s32.totalorder %s2008_s14, %s1649_s18  ;;  %p1656_p13 = scmp.lt.u32.totalorder %s1654_s29, %s1649_s18 }
  0x25   : > { %p1658_p2 = scmp.lt.u32.totalorder %s1649_s18, %s2008_s14 }
  0x26   : > { %p1652_p10 = pnand %p2019_p9, %p1650_p8  ;;  %p1657_p0 = por %p1656_p13, %p1655_p12 }
  0x28   : > { %p1653_p11 = pneg %p1652_p10  ;;  %p1659_p4 = por %p1658_p2, %p1657_p0 }
  0x2a   : > { %p1660_p5 = pnand %p1659_p4, %p1653_p11 }
  0x2c   : > { %1663 = shalt.err (!%p1660_p5)
}
  0x2d   : > { %s1664_s11 = scalar_lea.vmem %s2011_s16, 128  ;;  %s1891_s15 = smov [#allocation6]  }
  0x2e   : > { %p1665_p6 = scmp.ne.s32.totalorder %s2011_s16, %s1664_s11  ;;  %s1669_s20 = sshll.u32 %s1891_s15, 4  ;;  %s1670_s20 = int_to_ptr.vmem [resolvable:$false] %s1669_s20 }
  0x2f   : > { %s1671_s28 = scalar_lea.vmem %s1670_s20, 256  ;;  %p1672_p3 = scmp.lt.s32.totalorder %s2011_s16, %s1670_s20 }
  0x30   : > { %p1667_p8 = pnand %p1665_p6, %p2019_p9  ;;  %p1673_p1 = scmp.lt.s32.totalorder %s1671_s28, %s1664_s11 }
  0x32   : > { %p1668_p10 = pneg %p1667_p8  ;;  %p1674_p12 = por %p1673_p1, %p1672_p3 }
  0x34   : > { %p1675_p13 = pnand %p1674_p12, %p1668_p10 }
  0x36   : > { %1678 = shalt.err (!%p1675_p13)
}
  0x37   : > { %1557 = dma.hbm_to_vmem [thread:$0]  (!%p1996_p7), %s2008_s14, 128, %s2011_s16, %s2013_s17  }
  0x38   : > { %s2044_s18 = sadd.s32 4294967295, %s1889_s26   ;;  %s1413_s29 = sadd.s32 4294967294, %s1889_s26  }
  0x39   : > { %p73_p1 = scmp.ne.s32.totalorder %s1873_s22, %s1869_s21  ;;  %p2367_p3 = scmp.eq.s32.totalorder %s2044_s18, 0 }
  0x3a   : > { %p202_p11 = scmp.eq.s32.totalorder %s2044_s18, 1  ;;  %p208_p0 = scmp.eq.s32.totalorder %s1413_s29, 1 }
  0x3b   : > { %p1414_p2 = scmp.ge.s32.totalorder %s1889_s26, 1  ;;  %p2054_p4 = por %p2367_p3, %p73_p1 }
  0x3c   : > { %p2391_p5 = scmp.ne.s32.totalorder %s1877_s23, %s1873_s22  ;;  %p2065_p8 = por %p208_p0, %p73_p1 }
  0x3d   : > { %s2390_s12 = scalar_select %p2054_p4, 1, 0 }
  0x3e   : > { %p2061_p6 = por %p202_p11, %p2391_p5  ;;  %p245_p10 = scmp.lt.s32.totalorder %s1889_s26, 3 }
  0x3f   : > { %s2393_s16 = scalar_select %p2065_p8, 1, 0 }
  0x40   : > { %s2392_s14 = scalar_select %p2061_p6, 1, 0 }
  0x41   : > { %2394 = sst [smem:[#allocation24_spill]] %s2393_s16  ;;  %p2070_p12 = pnand %p1414_p2, %p245_p10 }
  0x42   : > { %s1892_s11 = smov [#allocation9]   ;;  %s2088_s30 = scalar_lea.hbm %s2353_s0, %s1994_s8 }
  0x43   : > { %s2395_s13 = scalar_select %p2070_p12, 1, 0 }
  0x44   : > { %s260_s15 = sshll.u32 %s1892_s11, 4  ;;  %p1547_p13 = pneg %p2070_p12  ;;  %s2074_s15 = int_to_ptr.vmem [resolvable:$true] %s260_s15 }
  0x45   : > { %s281_s1 = scalar_lea.vmem [#allocation3], %s1991_s7  ;;  %s1679_s10 = scalar_lea.hbm %s2356_s3, 512 }
  0x46   : > { %p2080_p11 = pnand %p1547_p13, %p2367_p3  ;;  %s290_s27 = sshll.u32 %s281_s1, 4  ;;  %s2091_s27 = int_to_ptr.vmem [resolvable:$true] %s290_s27 }
  0x47   : > { %p1680_p1 = scmp.ne.s32.totalorder %s2356_s3, %s1679_s10  ;;  %p1686_p10 = scmp.lt.u32.totalorder %s1679_s10, %s2356_s3 }
  0x48   : > { %p1681_p0 = pneg %p2080_p11 }
  0x4a   : > { %p1682_p2 = pnand %p1681_p0, %p1680_p1 }
  0x4c   : > { %p1683_p5 = pneg %p1682_p2 }
  0x4e   : > { %p1688_p13 = pnand %p1686_p10, %p1683_p5 }
  0x50   : > { %1691 = shalt.err (!%p1688_p13)
}
  0x51   : > { %s1692_s1 = scalar_lea.vmem %s2074_s15, 512  ;;  %p1700_p4 = scmp.lt.s32.totalorder %s2074_s15, %s2074_s15 }
  0x52   : > { %p1693_p3 = scmp.ne.s32.totalorder %s2074_s15, %s1692_s1  ;;  %p1701_p12 = scmp.lt.s32.totalorder %s1692_s1, %s1692_s1 }
  0x54   : > { %p1695_p8 = pnand %p1693_p3, %p1681_p0  ;;  %p1702_p7 = por %p1701_p12, %p1700_p4 }
  0x56   : > { %p1696_p6 = pneg %p1695_p8 }
  0x58   : > { %p1703_p9 = pnand %p1702_p7, %p1696_p6 }
  0x5a   : > { %1706 = shalt.err (!%p1703_p9)
}
  0x5b   : > { %s1893_s25 = smov 128   ;;  %s1894_s26 = smov 8  }
  0x5c   : > { %1550 = dma.hbm_to_vmem [thread:$0]  (!%p2080_p11), %s2356_s3, 512, %s2074_s15, [#allocation10], %s1893_s25, %s1893_s25, %s1894_s26  }
  0x5d   : > { %s2397_s11 = sand.u32 1, %s1877_s23   ;;  %s1707_s29 = scalar_lea.hbm %s2088_s30, 128 }
  0x5e   : > { %s278_s28 = scalar_lea.sflag [#allocation4], %s2397_s11  ;;  %p1708_p7 = scmp.ne.s32.totalorder %s2088_s30, %s1707_s29 }
  0x5f   : > { %p2398_p9 = scmp.ne.s32.totalorder %s2389_s19, 0  ;;  %s1712_s5 = scalar_lea.hbm %s2353_s0, 256 }
  0x60   : > { %p1713_p6 = scmp.lt.u32.totalorder %s2088_s30, %s2353_s0  ;;  %p1714_p8 = scmp.lt.u32.totalorder %s1712_s5, %s1707_s29 }
  0x61   : > { %p1710_p3 = pnand %p1708_p7, %p2398_p9  ;;  %p1716_p1 = scmp.lt.u32.totalorder %s1707_s29, %s2088_s30 }
  0x62   : > { %p1715_p12 = por %p1714_p8, %p1713_p6 }
  0x63   : > { %p1711_p4 = pneg %p1710_p3 }
  0x64   : > { %p1717_p0 = por %p1716_p1, %p1715_p12 }
  0x66   : > { %p1718_p11 = pnand %p1717_p0, %p1711_p4 }
  0x68   : > { %1721 = shalt.err (!%p1718_p11)
}
  0x69   : > { %s1722_s15 = scalar_lea.vmem %s2091_s27, 128  ;;  %s1895_s21 = smov [#allocation3]  }
  0x6a   : > { %p1723_p2 = scmp.ne.s32.totalorder %s2091_s27, %s1722_s15  ;;  %s1727_s20 = sshll.u32 %s1895_s21, 4  ;;  %s1728_s20 = int_to_ptr.vmem [resolvable:$false] %s1727_s20 }
  0x6b   : > { %s1729_s4 = scalar_lea.vmem %s1728_s20, 256  ;;  %p1730_p13 = scmp.lt.s32.totalorder %s2091_s27, %s1728_s20 }
  0x6c   : > { %p1725_p5 = pnand %p1723_p2, %p2398_p9  ;;  %p1731_p7 = scmp.lt.s32.totalorder %s1729_s4, %s1722_s15 }
  0x6e   : > { %p1726_p10 = pneg %p1725_p5  ;;  %p1732_p3 = por %p1731_p7, %p1730_p13 }
  0x70   : > { %p1733_p6 = pnand %p1732_p3, %p1726_p10 }
  0x72   : > { %1736 = shalt.err (!%p1733_p6)
}
  0x73   : > { %p2399_p4 = scmp.ne.s32.totalorder %s2386_s9, 0  ;;  %s2141_s25 = scalar_lea.hbm %s2355_s2, %s1994_s8 }
  0x74   : > { %s320_s26 = scalar_lea.vmem [#allocation8], %s1991_s7  ;;  %s1737_s16 = scalar_lea.hbm %s2141_s25, 128 }
  0x75   : > { %1554 = dma.hbm_to_vmem [thread:$0]  (!%p2399_p4), %s2088_s30, 128, %s2091_s27, %s278_s28  }
  0x76   : > { %s328_s10 = sshll.u32 %s320_s26, 4  ;;  %p1738_p8 = scmp.ne.s32.totalorder %s2141_s25, %s1737_s16  ;;  %s329_s10 = int_to_ptr.vmem [resolvable:$true] %s328_s10 }
  0x77   : > { %s1742_s27 = scalar_lea.hbm %s2355_s2, 256  ;;  %p1743_p0 = scmp.lt.u32.totalorder %s2141_s25, %s2355_s2 }
  0x78   : > { %p1740_p12 = pnand %p1738_p8, %p2398_p9  ;;  %p1744_p11 = scmp.lt.u32.totalorder %s1742_s27, %s1737_s16 }
  0x79   : > { %p1746_p5 = scmp.lt.u32.totalorder %s1737_s16, %s2141_s25 }
  0x7a   : > { %p1741_p1 = pneg %p1740_p12  ;;  %p1745_p2 = por %p1744_p11, %p1743_p0 }
  0x7c   : > { %p1747_p10 = por %p1746_p5, %p1745_p2 }
  0x7e   : > { %p1748_p13 = pnand %p1747_p10, %p1741_p1 }
  0x80   : > { %1751 = shalt.err (!%p1748_p13)
}
  0x81   : > { %s1752_s7 = scalar_lea.vmem %s329_s10, 128  ;;  %s1896_s8 = smov [#allocation8]  }
  0x82   : > { %p1753_p7 = scmp.ne.s32.totalorder %s329_s10, %s1752_s7  ;;  %s1757_s1 = sshll.u32 %s1896_s8, 4  ;;  %s1758_s1 = int_to_ptr.vmem [resolvable:$false] %s1757_s1 }
  0x83   : > { %s1759_s15 = scalar_lea.vmem %s1758_s1, 256  ;;  %p1760_p8 = scmp.lt.s32.totalorder %s329_s10, %s1758_s1 }
  0x84   : > { %p1755_p3 = pnand %p1753_p7, %p2398_p9  ;;  %p1761_p12 = scmp.lt.s32.totalorder %s1759_s15, %s1752_s7 }
  0x86   : > { %p1756_p6 = pneg %p1755_p3  ;;  %p1762_p4 = por %p1761_p12, %p1760_p8 }
  0x88   : > { %p1763_p0 = pnand %p1762_p4, %p1756_p6 }
  0x8a   : > { %1766 = shalt.err (!%p1763_p0)
}
  0x8b   : > { %p2400_p11 = scmp.ne.s32.totalorder %s2386_s9, 0  ;;  %p2401_p1 = scmp.ne.s32.totalorder %s2395_s13, 0 }
  0x8c   : > { %s2165_s19 = sand.u32 (!%p2401_p1), 1, %s1873_s22   ;;  %p2402_p9 = scmp.ne.s32.totalorder (!%p2401_p1), %s2390_s12, 0 }
  0x8d   : > { %1560 = dma.hbm_to_vmem [thread:$0]  (!%p2400_p11), %s2141_s25, 128, %s329_s10, %s2013_s17  }
  0x8e   : > { %337 = sbr.rel (%p2401_p1) target bundleno = 1378 (0x562), region = 40  ;;  %s2168_s21 = sshll.u32 (!%p2401_p1), %s2165_s19, 3 }
  0x8f   : > { %s340_s20 = scalar_lea.sflag (!%p2401_p1), [#allocation4], %s2165_s19  ;;  %s343_s4 = scalar_lea.vmem (!%p2401_p1), [#allocation3], %s2168_s21 }
  0x95   : > { %1848 = dma.done.wait (%p2402_p9), %s340_s20, 128  }
  0x96   : > { %1850 = vsyncadd (%p2402_p9), %s340_s20, 4294967168  ;;  %s348_s9 = sand.u32 1, %s2044_s18   ;;  %s352_s13 = scalar_lea.vmem [#allocation6], %s2168_s21 }
  0x97   : > { %s349_s17 = scalar_lea.sflag [#allocation7], %s348_s9 }
  0x98   : > { %1852 = dma.done.wait (%p2402_p9), %s349_s17, 256  }
  0x99   : > { %1854 = vsyncadd (%p2402_p9), %s349_s17, 4294967040  ;;  %s361_s5 = scalar_lea.vmem [#allocation8], %s2168_s21  ;;  %p2403_p4 = scmp.eq.s32.totalorder %s2044_s18, 0 }
  0x9b   : > { %1856 = dma.done.wait (%p2403_p4), [#allocation10], 512   ;;  %p2404_p2 = pmov %p2403_p4 }
  0x9c   : > { %v1897_v0 = vmov 0.0   ;;  %vm1898_vm0 = vmmov 0   ;;  %vm421_vm1 = vcmask 64512   ;;  %v419_v1 = vld [vmem:[%s352_s13] sm:$0xff]  ;;  %v417_v2 = vld [vmem:[%s343_s4] sm:$0xff]  ;;  %s1899_s12 = smov 120  }
  0x9d   : > { %1858 = vsyncadd (%p2404_p2), [#allocation10], 4294966784  ;;  %1476 = vmatprep.subr.mxu0 %v1897_v0  ;;  %1478 = vmatprep.mubr.msk.f32.mxu0 %vm1898_vm0, %v1897_v0  ;;  %v418_v3 = vmul.f32 0.35355338, %v417_v2  ;;  %s1900_s18 = smov 112   ;;  %s1901_s6 = smov 104  }
  0x9e   : > { %1486 = vmatprep.subr.mxu1 %v1897_v0  ;;  %1488 = vmatprep.mubr.msk.f32.mxu1 %vm1898_vm0, %v1897_v0  ;;  %v420_v10 = vld [vmem:[%s361_s5] sm:$0xff]  ;;  %s1429_s25 = sshll.u32 %s2165_s19, 5  ;;  %v1102_v60 = vld [vmem:[#allocation9] sm:$0xff]  ;;  %v1103_v61 = vld [vmem:[#allocation9 + $0x8] sm:$0xff]  ;;  %v1902_v62 = vmov 0.0|0.0   ;;  %vm415_vm2 = vcmask 261120  }
  0x9f   : > { %585 = vrot.lane.b32.xlu0 %v419_v1, %s1899_s12  ;;  %1477 = vmatpush3.xpose.msk.msra.mxu0 %vm421_vm1, %v419_v1  ;;  %s2233_s26 = scalar_lea.vmem [#allocation12], %s1429_s25  ;;  %v1528_v63 = vpack.c.bf16 %v1103_v61, %v1102_v60  ;;  %v1105_v2 = vld [vmem:[#allocation9 + $0x18] sm:$0xff]  ;;  %416 = vst.msk [vmem:[#allocation2] sm:$0xff] %vm415_vm2, %v1897_v0  ;;  %s1903_s10 = smov 8   ;;  %vm1098_vm3 = vcmask 130048   ;;  %vm1100_vm4 = vcmask 195584  }
  0xa0   : > { %753 = vrot.lane.b32.xlu1 %v419_v1, %s1900_s18  ;;  %1481 = vmatprep.subr.mxu0 %v1897_v0  ;;  %s1904_s16 = smov 16   ;;  %s1905_s11 = smov 24  }
  0xa1   : > { %s1454_s29 = sshll.u32 %s1881_s24, 9  ;;  %s1232_s27 = sshll.u32 %s2233_s26, 4  ;;  %s2267_s27 = int_to_ptr.vmem [resolvable:$true] %s1232_s27 }
  0xa2   : > { %1479 = vmatmul.mubr.msk.f32.vlgmr.msra.gmra.mrb[0].mxu0 %vm421_vm1, %v418_v3  ;;  %s2405_s7 = sld [smem:[#allocation28_spill]]  ;;  %s1202_s1 = scalar_lea.sflag [#allocation13], %s2165_s19 }
  0xa3   : > { %583 = vrot.lane.b32.xlu0 %v418_v3, %s1899_s12  ;;  %1483 = vmatprep.mubr.msk.f32.mxu0 %vm1898_vm0, %v1897_v0  ;;  %s1767_s15 = scalar_lea.vmem %s2267_s27, 512  ;;  %p2406_p10 = scmp.ne.s32.totalorder %s2392_s14, 0 }
  0xa4   : > { %751 = vrot.lane.b32.xlu1 %v418_v3, %s1900_s18  ;;  %1482 = vmatpush3.msra.mxu0 %v420_v10  ;;  %p1768_p5 = scmp.ne.s32.totalorder %s2267_s27, %s1767_s15  ;;  %s1906_s20 = smov [#allocation12]  }
  0xa5   : > { %1491 = vmatprep.subr.mxu0 %v1897_v0  ;;  %s1771_s4 = sshll.u32 %s1906_s20, 4  ;;  %s1772_s4 = int_to_ptr.vmem [resolvable:$false] %s1771_s4 }
  0xa6   : > { %p1769_p13 = pnand %p1768_p5, %p2406_p10  ;;  %s1773_s9 = scalar_lea.vmem %s1772_s4, 1024 }
  0xa7   : > { %920 = vrot.lane.b32.xlu0 %v419_v1, %s1901_s6  ;;  %v1104_v1 = vld [vmem:[#allocation9 + $0x10] sm:$0xff]  ;;  %p1774_p3 = scmp.lt.s32.totalorder %s2267_s27, %s1772_s4  ;;  %p1775_p6 = scmp.lt.s32.totalorder %s1773_s9, %s1767_s15 }
  0xa8   : > { %918 = vrot.lane.b32.xlu1 %v418_v3, %s1901_s6  ;;  %v1531_v3 = vpack.c.bf16 %v1105_v2, %v1104_v1  ;;  %s2265_s8 = scalar_lea.hbm %s2405_s7, %s1454_s29  ;;  %p1770_p7 = pneg %p1769_p13 }
  0xa9   : > { %p1776_p8 = por %p1775_p6, %p1774_p3 }
  0xab   : > { %p1777_p12 = pnand %p1776_p8, %p1770_p7 }
 0x111   : > { %v586_v4 = vpop.permute.xlu0 %585 }
 0x112   : > { %1487 = vmatpush3.xpose.msk.msra.mxu1 %vm421_vm1, %v586_v4  ;;  %v754_v5 = vpop.permute.xlu1 %753 }
 0x113   : > { %1496 = vmatprep.subr.mxu1 %v1897_v0 }
 0x115   : > { %v584_v6 = vpop.permute.xlu0 %583 }
 0x116   : > { %1489 = vmatmul.mubr.msk.f32.vlgmr.msra.gmra.mrb[0].mxu1 %vm421_vm1, %v584_v6  ;;  %v752_v7 = vpop.permute.xlu1 %751 }
 0x117   : > { %1497 = vmatpush3.xpose.msk.msra.mxu1 %vm421_vm1, %v754_v5  ;;  %1498 = vmatprep.mubr.msk.f32.mxu1 %vm1898_vm0, %v1897_v0 }
 0x118   : > { %1506 = vmatprep.subr.mxu1 %v1897_v0 }
 0x119   : > { %v921_v8 = vpop.permute.xlu0 %920 }
 0x11a   : > { %1499 = vmatmul.mubr.msk.f32.vlgmr.msra.gmra.mrb[2].mxu1 %vm421_vm1, %v752_v7  ;;  %v919_v9 = vpop.permute.xlu1 %918 }
 0x11b   : > { %1507 = vmatpush3.xpose.msk.msra.mxu1 %vm421_vm1, %v921_v8  ;;  %1508 = vmatprep.mubr.msk.f32.mxu1 %vm1898_vm0, %v1897_v0 }
 0x11c   : > { %1527 = vmatprep.subr.bf16.mxu1 %v1902_v62 }
 0x11e   : > { %1509 = vmatmul.mubr.msk.f32.vlgmr.msra.gmra.mrb[4].mxu1 %vm421_vm1, %v919_v9 }
 0x11f   : > { %1524 = vmatprep.mubr.msk.f32.mxu1 %vm1898_vm0, %v1897_v0  ;;  %1529 = vmatpush3.bf16.msra.mxu1 %v1528_v63 }
 0x120   : > { %1530 = vmatprep.subr.bf16.mxu1 %v1902_v62 }
 0x123   : > { %1532 = vmatpush3.bf16.msra.mxu1 %v1531_v3 }
 0x175   : > { %v494_v11 = vpop.f32.mrb[0].mxu0 }
 0x176   : > { %v498_v12 = vsel %vm421_vm1, %v494_v11, -inf  ;;  %v1480_v13 = vpop.f32.mrb[1].mxu0 }
 0x177   : > { %499 = vmax.xlane.f32.xlu0 %v498_v12 }
 0x1e9   : > { %v657_v14 = vpop.f32.mrb[0].mxu1 }
 0x1ea   : > { %v1490_v15 = vpop.f32.mrb[1].mxu1  ;;  %v661_v16 = vsel %vm421_vm1, %v657_v14, -inf }
 0x1eb   : > { %662 = vmax.xlane.f32.xlu1 %v661_v16 }
 0x1ed   : > { %v825_v17 = vpop.f32.mrb[2].mxu1 }
 0x1ee   : > { %v1500_v18 = vpop.f32.mrb[3].mxu1  ;;  %v829_v19 = vsel %vm421_vm1, %v825_v17, -inf }
 0x1ef   : > { %830 = vmax.xlane.f32.xlu0 %v829_v19 }
 0x1f1   : > { %v992_v20 = vpop.f32.mrb[4].mxu1 }
 0x1f2   : > { %v1510_v21 = vpop.f32.mrb[5].mxu1  ;;  %v996_v22 = vsel %vm421_vm1, %v992_v20, -inf }
 0x1f3   : > { %997 = vmax.xlane.f32.xlu0 %v996_v22 }
 0x1fc   : > { %675 = vrot.lane.b32.xlu1 %v420_v10, %s1899_s12 }
 0x204   : > { %v500_v23 = vpop.xlane.xlu0 %499 }
 0x205   : > { %v501_v24 = vsub.f32 %v494_v11, %v500_v23 }
 0x207   : > { %v502_v25 = vmul.f32 1.442695, %v501_v24 }
 0x209   : > { %1633 = vpow2.f32 %v502_v25 }
 0x213   : > { %v1634_v26 = vpop.eup %1633 }
 0x214   : > { %v504_v27 = vsel %vm421_vm1, %v1634_v26, 0.0 }
 0x220   : > { %505 = vadd.xlane.f32.xlu1 %v504_v27 }
 0x278   : > { %v663_v28 = vpop.xlane.xlu1 %662 }
 0x279   : > { %v664_v29 = vsub.f32 %v657_v14, %v663_v28 }
 0x27b   : > { %v665_v30 = vmul.f32 1.442695, %v664_v29 }
 0x27c   : > { %v831_v31 = vpop.xlane.xlu0 %830  ;;  %v676_v43 = vpop.permute.xlu1 %675 }
 0x27d   : > { %1635 = vpow2.f32 %v665_v30  ;;  %v832_v32 = vsub.f32 %v825_v17, %v831_v31 }
 0x27f   : > { %v833_v33 = vmul.f32 1.442695, %v832_v32 }
 0x280   : > { %v998_v34 = vpop.xlane.xlu0 %997 }
 0x281   : > { %1637 = vpow2.f32 %v833_v33  ;;  %v999_v35 = vsub.f32 %v992_v20, %v998_v34 }
 0x283   : > { %v1000_v36 = vmul.f32 1.442695, %v999_v35 }
 0x285   : > { %1639 = vpow2.f32 %v1000_v36 }
 0x287   : > { %v1636_v37 = vpop.eup %1635 }
 0x288   : > { %v667_v38 = vsel %vm421_vm1, %v1636_v37, 0.0 }
 0x289   : > { %668 = vadd.xlane.f32.xlu0 %v667_v38 }
 0x28b   : > { %v1638_v39 = vpop.eup %1637 }
 0x28c   : > { %v835_v40 = vsel %vm421_vm1, %v1638_v39, 0.0 }
 0x28d   : > { %836 = vadd.xlane.f32.xlu1 %v835_v40 }
 0x28f   : > { %v1640_v41 = vpop.eup %1639 }
 0x290   : > { %v1002_v42 = vsel %vm421_vm1, %v1640_v41, 0.0 }
 0x291   : > { %1003 = vadd.xlane.f32.xlu0 %v1002_v42 }
 0x29e   : > { %1009 = vrot.lane.b32.xlu1 %v420_v10, %s1901_s6 }
 0x2a7   : > { %842 = vrot.lane.b32.xlu0 %v420_v10, %s1900_s18 }
 0x2ad   : > { %v506_v44 = vpop.xlane.xlu1 %505 }
 0x2ae   : > { %1641 = vrcp.f32 %v506_v44 }
 0x2b8   : > { %v1642_v45 = vpop.eup %1641 }
 0x2b9   : > { %v508_v46 = vmul.f32 %v1642_v45, %v1634_v26 }
 0x2bb   : > { %509 = vst.msk [vmem:[%s2233_s26] sm:$0xff] %vm421_vm1, %v508_v46  ;;  %1484 = vmatmul.mubr.msk.f32.vlgmr.msra.gmra.mrb[2].mxu0 %vm421_vm1, %v508_v46 }
 0x2bc   : > { %1492 = vmatpush3.msra.mxu0 %v676_v43  ;;  %1493 = vmatprep.mubr.msk.f32.mxu0 %vm1898_vm0, %v1897_v0 }
 0x2bd   : > { %1501 = vmatprep.subr.mxu0 %v1897_v0 }
 0x316   : > { %v669_v47 = vpop.xlane.xlu0 %668 }
 0x317   : > { %1643 = vrcp.f32 %v669_v47 }
 0x31a   : > { %v837_v48 = vpop.xlane.xlu1 %836 }
 0x31b   : > { %1645 = vrcp.f32 %v837_v48 }
 0x31e   : > { %v1004_v49 = vpop.xlane.xlu0 %1003  ;;  %v1010_v55 = vpop.permute.xlu1 %1009 }
 0x31f   : > { %1647 = vrcp.f32 %v1004_v49 }
 0x321   : > { %v1644_v50 = vpop.eup %1643 }
 0x322   : > { %v671_v51 = vmul.f32 %v1644_v50, %v1636_v37  ;;  %v843_v52 = vpop.permute.xlu0 %842 }
 0x324   : > { %1435 = vst.msk [vmem:[%s2233_s26 + $0x8] sm:$0xff] %vm421_vm1, %v671_v51  ;;  %1494 = vmatmul.mubr.msk.f32.vlgmr.msra.gmra.mrb[4].mxu0 %vm421_vm1, %v671_v51 }
 0x325   : > { %v1646_v53 = vpop.eup %1645  ;;  %1502 = vmatpush3.msra.mxu0 %v843_v52  ;;  %1503 = vmatprep.mubr.msk.f32.mxu0 %vm1898_vm0, %v1897_v0 }
 0x326   : > { %v839_v54 = vmul.f32 %v1646_v53, %v1638_v39  ;;  %1511 = vmatprep.subr.mxu0 %v1897_v0 }
 0x328   : > { %1439 = vst.msk [vmem:[%s2233_s26 + $0x10] sm:$0xff] %vm421_vm1, %v839_v54  ;;  %1504 = vmatmul.mubr.msk.f32.vlgmr.msra.gmra.mrb[6].mxu0 %vm421_vm1, %v839_v54 }
 0x329   : > { %v1648_v56 = vpop.eup %1647  ;;  %1512 = vmatpush3.msra.mxu0 %v1010_v55  ;;  %1513 = vmatprep.mubr.msk.f32.mxu0 %vm1898_vm0, %v1897_v0 }
 0x32a   : > { %v1006_v57 = vmul.f32 %v1648_v56, %v1640_v41 }
 0x32c   : > { %1443 = vst.msk [vmem:[%s2233_s26 + $0x18] sm:$0xff] %vm421_vm1, %v1006_v57  ;;  %1514 = vmatmul.mubr.msk.f32.vlgmr.msra.gmra.mrb[8].mxu0 %vm421_vm1, %v1006_v57 }
 0x38e   : > { %v579_v58 = vpop.f32.mrb[2].mxu0 }
 0x38f   : > { %v1485_v59 = vpop.f32.mrb[3].mxu0 }
 0x3f7   : > { %v747_v4 = vpop.f32.mrb[4].mxu0 }
 0x3f8   : > { %1086 = vrot.lane.b32.xlu1 %v747_v4, %s1903_s10  ;;  %v1495_v5 = vpop.f32.mrb[5].mxu0 }
 0x3fb   : > { %v914_v6 = vpop.f32.mrb[6].mxu0 }
 0x3fc   : > { %1090 = vrot.lane.b32.xlu0 %v914_v6, %s1904_s16  ;;  %v1505_v7 = vpop.f32.mrb[7].mxu0 }
 0x3ff   : > { %v1081_v8 = vpop.f32.mrb[8].mxu0 }
 0x400   : > { %1094 = vrot.lane.b32.xlu1 %v1081_v8, %s1905_s11  ;;  %v1515_v9 = vpop.f32.mrb[9].mxu0 }
 0x46a   : > { %v1087_v10 = vpop.permute.xlu1 %1086 }
 0x46b   : > { %v1097_v11 = vsel %vm421_vm1, %v579_v58, %v1087_v10 }
 0x46e   : > { %v1091_v0 = vpop.permute.xlu0 %1090 }
 0x46f   : > { %v1099_v12 = vsel %vm1098_vm3, %v1097_v11, %v1091_v0 }
 0x472   : > { %v1095_v13 = vpop.permute.xlu1 %1094 }
 0x473   : > { %v1101_v14 = vsel %vm1100_vm4, %v1099_v12, %v1095_v13 }
 0x474   : > { %1525 = vmatmul.mubr.msk.f32.vlgmr.msra.gmra.mrb[6].mxu1 %vm415_vm2, %v1101_v14 }
 0x475   : > { %1780 = shalt.err (!%p1777_p12)
}
 0x476   : > { %s1781_s17 = scalar_lea.hbm %s2265_s8, 512  ;;  %s1785_s12 = scalar_lea.hbm %s2405_s7, 1024 }
 0x477   : > { %p1782_p0 = scmp.ne.s32.totalorder %s2265_s8, %s1781_s17  ;;  %p1786_p9 = scmp.lt.u32.totalorder %s2265_s8, %s2405_s7 }
 0x478   : > { %p1787_p4 = scmp.lt.u32.totalorder %s1785_s12, %s1781_s17  ;;  %p1789_p5 = scmp.lt.u32.totalorder %s1781_s17, %s2265_s8 }
 0x479   : > { %p1783_p11 = pnand %p1782_p0, %p2406_p10 }
 0x47a   : > { %p1788_p2 = por %p1787_p4, %p1786_p9 }
 0x47b   : > { %p1784_p1 = pneg %p1783_p11 }
 0x47c   : > { %p1790_p13 = por %p1789_p5, %p1788_p2 }
 0x47e   : > { %p1791_p7 = pnand %p1790_p13, %p1784_p1 }
 0x480   : > { %1794 = shalt.err (!%p1791_p7)
}
 0x481   : > { %s1907_s25 = smov 128   ;;  %v1106_v15 = vld [vmem:[#allocation2] sm:$0xff]  ;;  %s2407_s11 = sld [smem:[#allocation26_spill]] }
 0x482   : > { %1544 = dma.vmem_to_hbm [thread:$0]  (%p2406_p10), %s2267_s27, 512, %s2265_s8, %s1202_s1, %s1907_s25, %s1907_s25, %s1903_s10  }
 0x483   : > { %s1449_s29 = sshll.u32 %s1881_s24, 7  ;;  %s401_s30 = scalar_lea.vmem [#allocation11], %s2168_s21 }
 0x484   : > { %s1216_s28 = sshll.u32 %s401_s30, 4  ;;  %s2408_s4 = sld [smem:[#allocation27_spill]]  ;;  %s2305_s28 = int_to_ptr.vmem [resolvable:$true] %s1216_s28 }
 0x485   : > { %s1197_s27 = scalar_lea.sflag [#allocation5], %s2165_s19  ;;  %s1795_s8 = scalar_lea.vmem %s2305_s28, 128 }
 0x486   : > { %p1796_p3 = scmp.ne.s32.totalorder %s2305_s28, %s1795_s8  ;;  %s1908_s24 = smov [#allocation11]  }
 0x487   : > { %v1446_v19 = vld [vmem:[%s2407_s11] ss:$0 sm:$0xff]  ;;  %s1799_s21 = sshll.u32 %s1908_s24, 4  ;;  %s1800_s21 = int_to_ptr.vmem [resolvable:$false] %s1799_s21 }
 0x488   : > { %p1797_p6 = pnand %p1796_p3, %p2406_p10  ;;  %s1801_s1 = scalar_lea.vmem %s1800_s21, 256 }
 0x489   : > { %p1802_p12 = scmp.lt.s32.totalorder %s2305_s28, %s1800_s21  ;;  %p1803_p0 = scmp.lt.s32.totalorder %s1801_s1, %s1795_s8 }
 0x48a   : > { %s2303_s10 = scalar_lea.hbm %s2408_s4, %s1449_s29  ;;  %p1798_p8 = pneg %p1797_p6 }
 0x48b   : > { %p1804_p11 = por %p1803_p0, %p1802_p12 }
 0x48d   : > { %p1805_p1 = pnand %p1804_p11, %p1798_p8 }
 0x547   : > { %v1177_v16 = vpop.f32.mrb[6].mxu1 }
 0x548   : > { %v1181_v17 = vadd.f32 %v1177_v16, %v1106_v15  ;;  %v1526_v18 = vpop.f32.mrb[7].mxu1 }
 0x54a   : > { %1182 = vst.msk [vmem:[#allocation2] sm:$0xff] %vm415_vm2, %v1181_v17 }
 0x551   : > { %v1186_v20 = vld [vmem:[#allocation2] sm:$0xff] }
 0x552   : > { %v1194_v21 = vadd.f32 %v1446_v19, %v1186_v20 }
 0x554   : > { %1195 = vst.msk [vmem:[%s401_s30] sm:$0xff] %vm415_vm2, %v1194_v21 }
 0x555   : > { %1808 = shalt.err (!%p1805_p1)
}
 0x556   : > { %s1809_s19 = scalar_lea.hbm %s2303_s10, 128  ;;  %s1813_s13 = scalar_lea.hbm %s2408_s4, 256 }
 0x557   : > { %p1810_p9 = scmp.ne.s32.totalorder %s2303_s10, %s1809_s19  ;;  %p1814_p5 = scmp.lt.u32.totalorder %s2303_s10, %s2408_s4 }
 0x558   : > { %p1815_p13 = scmp.lt.u32.totalorder %s1813_s13, %s1809_s19  ;;  %p1817_p3 = scmp.lt.u32.totalorder %s1809_s19, %s2303_s10 }
 0x559   : > { %p1811_p4 = pnand %p1810_p9, %p2406_p10 }
 0x55a   : > { %p1816_p7 = por %p1815_p13, %p1814_p5 }
 0x55b   : > { %p1812_p2 = pneg %p1811_p4 }
 0x55c   : > { %p1818_p6 = por %p1817_p3, %p1816_p7 }
 0x55e   : > { %p1819_p8 = pnand %p1818_p6, %p1812_p2 }
 0x560   : > { %1822 = shalt.err (!%p1819_p8)
}
 0x561   : > { %1543 = dma.vmem_to_hbm [thread:$0]  (%p2406_p10), %s2305_s28, 128, %s2303_s10, %s1197_s27  }
 0x562 PF: > { %s2409_s18 = sld [smem:[#allocation19_spill]]  ;;  %s2410_s6 = sld [smem:[#allocation24_spill]] }
 0x563   : > { %s2411_s25 = sld [smem:[#allocation21_spill]] }
 0x568   : > { %s1247_s26 = sand.u32 1, %s2409_s18   ;;  %p2412_p12 = scmp.ne.s32.totalorder %s2410_s6, 0 }
 0x569   : > { %p2413_p0 = scmp.ge.s32.totalorder %s2411_s25, 2  ;;  %s1248_s16 = scalar_lea.sflag [#allocation5], %s1247_s26 }
 0x56b   : > { %p1562_p11 = pnand %p2413_p0, %p2412_p12 }
 0x56d   : > { %1860 = dma.done.wait (!%p1562_p11), %s1248_s16, 128  }
 0x56e   : > { %1862 = vsyncadd (!%p1562_p11), %s1248_s16, 4294967168  ;;  %s1257_s11 = scalar_lea.sflag [#allocation13], %s1247_s26 }
 0x56f   : > { %1864 = dma.done.wait (!%p1562_p11), %s1257_s11, 512  }
 0x570   : > { %1866 = vsyncadd (!%p1562_p11), %s1257_s11, 4294966784  ;;  %s30_s26 = sadd.s32 1, %s2411_s25   ;;  %s2414_s14 = sld [smem:[#allocation23_spill]] }
 0x571   : > { %p27_p1 = scmp.ge.s32.totalorder %s30_s26, 4   ;;  %s2415_s24 = sld [smem:[#allocation20_spill]] }
 0x572   : > { %s2416_s25 = sld [smem:[#allocation22_spill]]  ;;  %s2417_s21 = smov %s1873_s22 }
 0x573   : > { %s2418_s22 = smov %s1877_s23  ;;  %29 = sbr.rel (!%p27_p1) target bundleno = 16 (0x10), region = 142 }
 0x576   : > { %s2419_s23 = smov %s2414_s14 }
 0x57a   :  { %1262 = vsyncpa [#allocation4], 1 }
 0x57b   :  { %1264 = vsyncpa [#allocation4 + $0x1], 1 }
 0x57c   :  { %1265 = vsyncpa [#allocation7], 1 }
 0x57d   :  { %1267 = vsyncpa [#allocation7 + $0x1], 1 }
 0x57e   :  { %1268 = vsyncpa [#allocation10], 1 }
 0x57f   :  { %1269 = vsyncpa [#allocation5], 1 }
 0x580   :  { %1271 = vsyncpa [#allocation5 + $0x1], 1 }
 0x581   :  { %1272 = vsyncpa [#allocation13], 1 }
 0x582   :  { %1274 = vsyncpa [#allocation13 + $0x1], 1 }

</bundles_post_ra>
